<compile_context>
chip_gen: v7x
topology: tpu7x:2x2x1
jax: 0.10.0
libtpu: 0.0.40
codegen_flags: <defaults>
</compile_context>

<pallas_src>
import functools

import jax
import jax.numpy as jnp
from jax.experimental import pallas as pl
from jax.experimental.pallas import tpu as pltpu


def _round_up(v, m):
    return ((v + m - 1) // m) * m


def _pick_chunk(C, T):
    # 128-aligned lane chunk small enough that each live f32 array stays at
    # roughly <= 16 vregs (16384 elements) -> no register spills.
    for c in (512, 256, 128):
        if c <= T and T % c == 0 and C * c <= 16384:
            return c
    return 128


def _lrn_kernel(x_ref, o_ref, *, local_size, alpha, beta, C, chunk):
    """Block: (Nb, C, T).  LRN window runs along C (sublanes) only."""
    Nb = x_ref.shape[0]
    T = x_ref.shape[2]
    n_chunks = T // chunk
    pad = min((local_size - 1) // 2, C - 1)   # offsets d >= C contribute nothing
    scale = float(alpha) / float(local_size)  # fold 1/size and alpha into one FMA

    # (C, 1) channel index; lane-broadcast at use -- avoids a full (C, T) iota.
    ch = jax.lax.broadcasted_iota(jnp.int32, (C, 1), 0)

    def one_chunk(b, t):
        off = pl.multiple_of(t * chunk, 128)
        sl = pl.ds(off, chunk)
        xf = x_ref[b, :, sl].astype(jnp.float32)
        sq = xf * xf                       # xf is dead here; reloaded for final mul
        acc = sq
        for d in range(1, pad + 1):
            below = pltpu.roll(sq, shift=d, axis=0)       # value from channel c-d
            above = pltpu.roll(sq, shift=C - d, axis=0)   # value from channel c+d
            lo = (ch >= d).astype(jnp.float32)            # (C, 1) boundary masks
            hi = (ch < C - d).astype(jnp.float32)
            acc = acc + below * lo + above * hi
        div = acc * scale + 1.0
        if float(beta) == 0.75:
            # div ** -0.75 == rsqrt(div) * sqrt(rsqrt(div)); div >= 1 always.
            r = jax.lax.rsqrt(div)
            inv = r * jnp.sqrt(r)
        else:
            inv = div ** (-float(beta))
        # Reload x (one vld per vreg) instead of holding xf across the window sum.
        o_ref[b, :, sl] = (x_ref[b, :, sl].astype(jnp.float32) * inv).astype(o_ref.dtype)

    def run_chunks(b):
        if n_chunks == 1:
            one_chunk(b, 0)
        else:
            def chunk_body(t, carry):
                one_chunk(b, t)
                return carry
            jax.lax.fori_loop(0, n_chunks, chunk_body, 0, unroll=True)

    if Nb == 1:
        run_chunks(0)
    else:
        def batch_body(b, carry):
            run_chunks(b)
            return carry
        jax.lax.fori_loop(0, Nb, batch_body, 0)


def lrn(x, local_size=1, alpha=1.0, beta=0.75, lane_tile=2048):
    """Across-channel LRN (PyTorch LRN, ACROSS_CHANNELS=True).  x: (N, C, H, W)."""
    # TODO(synk): ACROSS_CHANNELS=False (2-D spatial avg-pool window) is not
    # implemented; the module default (True) is what is reproduced here.
    assert local_size % 2 == 1, "symmetric-padding path assumes odd local_size"
    N, C, H, W = x.shape
    HW = H * W
    itemsize = jnp.dtype(x.dtype).itemsize

    # Lane-dense tiling of the flattened spatial axis.  No halo is needed (the
    # window mixes only along C), so a ragged last tile is fine: garbage lanes
    # never contaminate valid lanes and tail stores are masked by Pallas.
    T = min(_round_up(int(lane_tile), 128), _round_up(HW, 128))
    num_t = pl.cdiv(HW, T)

    # For small images fold several batch entries into one block so each grid
    # step moves ~1 MiB+, while keeping >= 2 grid steps (v7x has 2 TCs).
    Nb = 1
    if num_t == 1 and N > 1:
        nb_target = max(1, (1 << 20) // max(1, C * T * itemsize))
        nb_cap = max(1, min(nb_target, N // 2))
        for d in range(nb_cap, 0, -1):
            if N % d == 0:
                Nb = d
                break
    num_n = pl.cdiv(N, Nb)

    # If the whole problem would be a single grid step, split HW so both v7x
    # TensorCores get work (harmless on single-TC v5e/v6e).
    if num_n * num_t < 2 and HW > 128:
        T = _round_up(pl.cdiv(HW, 2), 128)
        num_t = pl.cdiv(HW, T)

    chunk = _pick_chunk(C, T)
    xr = x.reshape(N, C, HW)

    kernel = functools.partial(
        _lrn_kernel, local_size=local_size, alpha=alpha, beta=beta, C=C,
        chunk=chunk)

    # VMEM budget: double-buffered in+out blocks plus a small margin for the
    # per-chunk f32 intermediates.  Cap below physical VMEM (64 MiB/TC on v7x,
    # 128 MiB on v5e/v6e).
    block_bytes = Nb * C * T * itemsize
    need = 4 * block_bytes + (4 << 20)
    try:
        phys_vmem = int(getattr(pltpu.get_tpu_info(), "vmem_capacity_bytes",
                                64 << 20))
    except Exception:
        phys_vmem = 64 << 20
    vmem_limit = int(min((3 * phys_vmem) // 4, max(need, 16 << 20)))

    out = pl.pallas_call(
        kernel,
        out_shape=jax.ShapeDtypeStruct((N, C, HW), x.dtype),
        grid=(num_n, num_t),
        in_specs=[pl.BlockSpec((Nb, C, T), lambda n, t: (n, 0, t))],
        out_specs=pl.BlockSpec((Nb, C, T), lambda n, t: (n, 0, t)),
        compiler_params=pltpu.CompilerParams(
            dimension_semantics=("parallel", "parallel"),
            vmem_limit_bytes=vmem_limit),
    )(xr)

    return out.reshape(N, C, H, W)


def _lrn_reference(x, local_size=1, alpha=1.0, beta=0.75):
    # Pure-JAX reference of the PyTorch forward (across channels), in f32.
    N, C, H, W = x.shape
    pad = (local_size - 1) // 2
    xf = x.astype(jnp.float32)
    sq = xf * xf
    sq_pad = jnp.pad(sq, ((0, 0), (pad, pad), (0, 0), (0, 0)))
    acc = jnp.zeros_like(sq)
    for d in range(local_size):
        acc = acc + sq_pad[:, d:d + C]
    div = ((acc / float(local_size)) * alpha + 1.0) ** beta
    return (xf / div).astype(x.dtype)


if __name__ == "__main__":
    key = jax.random.PRNGKey(0)
    k1, k2 = jax.random.split(key)

    # Module defaults: local_size=1, alpha=1.0, beta=0.75, ACROSS_CHANNELS=True
    x1 = jax.random.normal(k1, (2, 4, 16, 16), dtype=jnp.float32)
    out1 = jax.block_until_ready(lrn(x1, local_size=1, alpha=1.0, beta=0.75))
    ref1 = _lrn_reference(x1, local_size=1, alpha=1.0, beta=0.75)
    assert out1.shape == x1.shape and out1.dtype == x1.dtype
    assert jnp.allclose(out1, ref1, atol=1e-5, rtol=1e-5)

    # Windowed (local_size > 1) path: AlexNet-style LRN parameters.
    x2 = jax.random.normal(k2, (2, 96, 16, 16), dtype=jnp.float32)
    out2 = jax.block_until_ready(lrn(x2, local_size=5, alpha=2e-4, beta=0.75))
    ref2 = _lrn_reference(x2, local_size=5, alpha=2e-4, beta=0.75)
    assert out2.shape == x2.shape and out2.dtype == x2.dtype
    assert jnp.allclose(out2, ref2, atol=1e-5, rtol=1e-5)

    print("KERNEL_OK")
</pallas_src>

<mosaic_0001>
module attributes {stable_mosaic.version = 11 : i64} {
  func.func @_lrn_kernel(%arg0: i32, %arg1: i32, %arg2: memref<1x4x256xf32, #tpu.memory_space<vmem>>, %arg3: memref<1x4x256xf32, #tpu.memory_space<vmem>>) attributes {dimension_semantics = [#tpu.dimension_semantics<parallel>, #tpu.dimension_semantics<parallel>], iteration_bounds = array<i64: 2, 1>, scalar_prefetch = 0 : i64, scratch_operands = 0 : i64, tpu.core_type = #tpu.core_type<tc>, window_params = [{transform_indices = @transform_0, window_bounds = array<i64: 1, 4, 256>}, {transform_indices = @transform_1, window_bounds = array<i64: 1, 4, 256>}]} {
    %c0_i32 = arith.constant 0 : i32
    %0 = tpu.assume_multiple %c0_i32, 128 : i32
    %c0 = arith.constant 0 : index
    %c0_0 = arith.constant 0 : index
    %1 = arith.index_cast %0 : i32 to index
    %2 = vector.load %arg2[%c0, %c0_0, %1] : memref<1x4x256xf32, #tpu.memory_space<vmem>>, vector<1x4x256xf32>
    %3 = vector.shape_cast %2 : vector<1x4x256xf32> to vector<4x256xf32>
    %4 = arith.mulf %3, %3 : vector<4x256xf32>
    %cst = arith.constant 1.000000e+00 : f32
    %5 = vector.broadcast %cst : f32 to vector<4x256xf32>
    %6 = arith.mulf %4, %5 : vector<4x256xf32>
    %cst_1 = arith.constant 1.000000e+00 : f32
    %7 = vector.broadcast %cst_1 : f32 to vector<4x256xf32>
    %8 = arith.addf %6, %7 : vector<4x256xf32>
    %9 = math.rsqrt %8 : vector<4x256xf32>
    %10 = math.sqrt %9 : vector<4x256xf32>
    %11 = arith.mulf %9, %10 : vector<4x256xf32>
    %c0_2 = arith.constant 0 : index
    %c0_3 = arith.constant 0 : index
    %12 = arith.index_cast %0 : i32 to index
    %13 = vector.load %arg2[%c0_2, %c0_3, %12] : memref<1x4x256xf32, #tpu.memory_space<vmem>>, vector<1x4x256xf32>
    %14 = vector.shape_cast %13 : vector<1x4x256xf32> to vector<4x256xf32>
    %15 = arith.mulf %14, %11 : vector<4x256xf32>
    %c0_4 = arith.constant 0 : index
    %c0_5 = arith.constant 0 : index
    %16 = arith.index_cast %0 : i32 to index
    %17 = vector.load %arg3[%c0_4, %c0_5, %16] : memref<1x4x256xf32, #tpu.memory_space<vmem>>, vector<1x4x256xf32>
    %18 = vector.shape_cast %17 : vector<1x4x256xf32> to vector<4x256xf32>
    %19 = vector.shape_cast %15 : vector<4x256xf32> to vector<1x4x256xf32>
    tpu.vector_store %arg3[%c0_4, %c0_5, %16], %19 {strides = array<i32>} : memref<1x4x256xf32, #tpu.memory_space<vmem>>, vector<1x4x256xf32>,
    return
  }
  func.func @transform_0(%arg0: i32, %arg1: i32) -> (i32, i32, i32) {
    %c0_i32 = arith.constant 0 : i32
    %c0_i32_0 = arith.constant 0 : i32
    return %arg0, %c0_i32, %arg1 : i32, i32, i32
  }
  func.func @transform_1(%arg0: i32, %arg1: i32) -> (i32, i32, i32) {
    %c0_i32 = arith.constant 0 : i32
    %c0_i32_0 = arith.constant 0 : i32
    return %arg0, %c0_i32, %arg1 : i32, i32, i32
  }
}

</mosaic_0001>

<bundles_post_ra>
// kernel: tpu_custom_call.1
= control target key start
LH: loop header
LB: loop body
LE: loop exit
PB: predicated region body
PF: predicated region fallthrough
CT: control target
= control target key end

     0   :  { %6 = vsyncpa [#allocation3], 0  ;;  %s649_s0 = inlined_call_operand.hbm [shape: f32[2,4,256], index: 0, kind: input, shape index: {}]   ;;  %s650_s1 = inlined_call_operand.hbm [shape: f32[2,4,256], index: 1, kind: output, shape index: {}]  }
   0x1   :  { %8 = vsyncpa [#allocation3 + $0x1], 0 }
   0x2   :  { %9 = vsyncpa [#allocation4], 0 }
   0x3   :  { %11 = vsyncpa [#allocation4 + $0x1], 0  ;;  %s477_s6 = smov 0   ;;  %s479_s7 = smov 0  }
   0x4   :  { %s481_s8 = smov 0   ;;  %s483_s9 = smov 0  }
   0x5   :  { %s485_s10 = smov 0   ;;  %s487_s11 = smov 0  }
   0x6 LB: > { %s268_s12 = sadd.s32 4294967295, %s463_s11   ;;  %s269_s13 = sadd.s32 4294967294, %s463_s11   ;;  %s463_s11 = sphi %s487_s11, %s17_s11   ;;  %s459_s10 = sphi %s485_s10, %s666_s10   ;;  %s455_s9 = sphi %s483_s9, %s665_s9   ;;  %s451_s8 = sphi %s481_s8, %s664_s8   ;;  %s447_s7 = sphi %s479_s7, %s663_s7   ;;  %s443_s6 = sphi %s477_s6, %s662_s6  }
   0x7   : > { %s29_s14 = sadd.s32 1, %s459_s10  ;;  %s38_s15 = sadd.s32 1, %s451_s8 }
   0x8   : > { %p31_p0 = scmp.ge.s32.totalorder %s29_s14, 2  ;;  %p45_p1 = scmp.ne.s32.totalorder %s451_s8, %s447_s7 }
   0x9   : > { %p46_p2 = scmp.eq.s32.totalorder %s463_s11, 0  ;;  %p51_p3 = scmp.ne.s32.totalorder %s447_s7, %s443_s6 }
   0xa   : > { %s668_s14 = smov (%p31_p0, %s29_s14), 0  ;;  %p52_p5 = scmp.eq.s32.totalorder %s268_s12, 0 }
   0xb   : > { %p518_p4 = por %p46_p2, %p45_p1  ;;  %s33_s17 = ssub.s32 %s459_s10, %s668_s14 }
   0xc   : > { %p77_p6 = scmp.eq.s32.totalorder %s268_s12, 1  ;;  %p36_p7 = scmp.eq.s32.totalorder %s33_s17, 0 }
   0xd   : > { %p524_p8 = por %p52_p5, %p51_p3  ;;  %p83_p10 = scmp.eq.s32.totalorder %s269_s13, 1 }
   0xe   : > { %p528_p9 = por %p77_p6, %p45_p1  ;;  %p297_p13 = scmp.lt.s32.totalorder %s463_s11, 2 }
   0xf   : > { %s533_s20 = scalar_select %p36_p7, %s451_s8, %s38_s15  }
  0x10   : > { %s654_s19 = scalar_select %p528_p9, 1, 0 }
  0x11   : > { %p535_p11 = por %p83_p10, %p51_p3  ;;  %s103_s22 = sand.u32 1, %s451_s8  }
  0x12   : > { %s272_s23 = sshll.u32 %s103_s22, 3  ;;  %s283_s24 = sshll.u32 %s459_s10, 7 }
  0x13   : > { %s655_s21 = scalar_select %p535_p11, 1, 0 }
  0x14   : > { %s546_s27 = scalar_lea.hbm %s649_s0, %s283_s24  ;;  %s107_s28 = scalar_lea.vmem [#allocation2], %s272_s23 }
  0x15   : > { %s117_s29 = sshll.u32 %s107_s28, 4  ;;  %p552_p0 = pnand %p297_p13, %p518_p4  ;;  %s548_s29 = int_to_ptr.vmem [resolvable:$true] %s117_s29 }
  0x16   : > { %s104_s2 = scalar_lea.sflag [#allocation3], %s103_s22  ;;  %s351_s3 = scalar_lea.hbm %s546_s27, 128 }
  0x17   : > { %p352_p3 = scmp.ne.s32.totalorder %s546_s27, %s351_s3  ;;  %p353_p5 = pneg %p552_p0 }
  0x18   : > { %s356_s12 = scalar_lea.hbm %s649_s0, 256  ;;  %p357_p4 = scmp.lt.u32.totalorder %s546_s27, %s649_s0 }
  0x19   : > { %p354_p6 = pnand %p353_p5, %p352_p3  ;;  %p358_p10 = scmp.lt.u32.totalorder %s356_s12, %s351_s3 }
  0x1a   : > { %p360_p12 = scmp.lt.u32.totalorder %s351_s3, %s546_s27 }
  0x1b   : > { %p355_p7 = pneg %p354_p6  ;;  %p359_p13 = por %p358_p10, %p357_p4 }
  0x1d   : > { %p361_p1 = por %p360_p12, %p359_p13 }
  0x1f   : > { %p362_p2 = pnand %p361_p1, %p355_p7 }
  0x21   : > { %365 = shalt.err (!%p362_p2)
}
  0x22   : > { %s366_s16 = scalar_lea.vmem %s548_s29, 128  ;;  %s465_s17 = smov [#allocation2]  }
  0x23   : > { %p367_p3 = scmp.ne.s32.totalorder %s548_s29, %s366_s16  ;;  %s371_s22 = sshll.u32 %s465_s17, 4  ;;  %s372_s22 = int_to_ptr.vmem [resolvable:$false] %s371_s22 }
  0x24   : > { %s373_s23 = scalar_lea.vmem %s372_s22, 256  ;;  %p374_p9 = scmp.lt.s32.totalorder %s548_s29, %s372_s22 }
  0x25   : > { %p369_p6 = pnand %p367_p3, %p353_p5  ;;  %p375_p4 = scmp.lt.s32.totalorder %s373_s23, %s366_s16 }
  0x27   : > { %p370_p11 = pneg %p369_p6  ;;  %p376_p10 = por %p375_p4, %p374_p9 }
  0x29   : > { %p377_p12 = pnand %p376_p10, %p370_p11 }
  0x2b   : > { %380 = shalt.err (!%p377_p12)
}
  0x2c   : > { %292 = dma.hbm_to_vmem [thread:$0]  (!%p552_p0), %s546_s27, 128, %s548_s29, %s104_s2  }
  0x2d   : > { %p657_p1 = scmp.lt.s32.totalorder %s463_s11, 3  ;;  %p658_p2 = scmp.ge.s32.totalorder %s463_s11, 1 }
  0x2f   : > { %p123_p5 = pnand %p658_p2, %p657_p1 }
  0x30   : > { %s588_s24 = sand.u32 (!%p123_p5), 1, %s447_s7  }
  0x31   : > { %126 = sbr.rel (%p123_p5) target bundleno = 106 (0x6a), region = 24  ;;  %s276_s25 = sshll.u32 (!%p123_p5), %s588_s24, 3 }
  0x32   : > { %s129_s26 = scalar_lea.sflag (!%p123_p5), [#allocation3], %s588_s24  ;;  %s132_s28 = scalar_lea.vmem (!%p123_p5), [#allocation2], %s276_s25 }
  0x38   : > { %434 = dma.done.wait (%p524_p8), %s129_s26, 128  }
  0x39   : > { %436 = vsyncadd (%p524_p8), %s129_s26, 4294967168  ;;  %v153_v0 = vld [vmem:[%s132_s28] sm:$0xff]  ;;  %s150_s27 = scalar_lea.vmem [#allocation5], %s276_s25  ;;  %s284_s18 = sshll.u32 %s455_s9, 7 }
  0x3a   : > { %v154_v1 = vmul.f32 %v153_v0, %v153_v0  ;;  %s184_s29 = sshll.u32 %s150_s27, 4  ;;  %s602_s3 = scalar_lea.hbm %s650_s1, %s284_s18  ;;  %s597_s29 = int_to_ptr.vmem [resolvable:$true] %s184_s29 }
  0x3b   : > { %s168_s4 = scalar_lea.sflag [#allocation4], %s588_s24  ;;  %s381_s5 = scalar_lea.vmem %s597_s29, 128 }
  0x3c   : > { %v155_v2 = vadd.f32 1.0, %v154_v1  ;;  %p382_p8 = scmp.ne.s32.totalorder %s597_s29, %s381_s5  ;;  %p659_p9 = scmp.ne.s32.totalorder %s654_s19, 0 }
  0x3d   : > { %s466_s9 = smov [#allocation5]  }
  0x3e   : > { %347 = vrsqrt.f32 %v155_v2  ;;  %p383_p11 = pnand %p382_p8, %p659_p9  ;;  %s385_s12 = sshll.u32 %s466_s9, 4  ;;  %s386_s12 = int_to_ptr.vmem [resolvable:$false] %s385_s12 }
  0x3f   : > { %s387_s13 = scalar_lea.vmem %s386_s12, 256  ;;  %p388_p7 = scmp.lt.s32.totalorder %s597_s29, %s386_s12 }
  0x40   : > { %p384_p0 = pneg %p383_p11  ;;  %p389_p13 = scmp.lt.s32.totalorder %s387_s13, %s381_s5 }
  0x42   : > { %p390_p3 = por %p389_p13, %p388_p7 }
  0x44   : > { %p391_p6 = pnand %p390_p3, %p384_p0 }
  0x48   : > { %v348_v3 = vpop.eup %347 }
  0x49   : > { %349 = vrsqrt.f32 %v348_v3  ;;  %vm159_vm0 = vcmp.eq.f32.partialorder %v348_v3, inf  ;;  %v162_v5 = vand.u32 2147483648, %v348_v3  ;;  %vm161_vm1 = vcmp.eq.f32.partialorder %v348_v3, 0.0 }
  0x53   : > { %v350_v4 = vpop.eup %349 }
  0x54   : > { %v158_v6 = vmul.f32 %v350_v4, %v348_v3 }
  0x56   : > { %v160_v7 = vsel %vm159_vm0, %v348_v3, %v158_v6 }
  0x57   : > { %v163_v8 = vsel %vm161_vm1, %v162_v5, %v160_v7 }
  0x58   : > { %v164_v9 = vmul.f32 %v348_v3, %v163_v8 }
  0x5a   : > { %v165_v10 = vmul.f32 %v164_v9, %v153_v0 }
  0x5c   : > { %166 = vst [vmem:[%s150_s27] sm:$0xff] %v165_v10 }
  0x5d   : > { %394 = shalt.err (!%p391_p6)
}
  0x5e   : > { %s395_s15 = scalar_lea.hbm %s602_s3, 128  ;;  %s399_s22 = scalar_lea.hbm %s650_s1, 256 }
  0x5f   : > { %p396_p4 = scmp.ne.s32.totalorder %s602_s3, %s395_s15  ;;  %p400_p1 = scmp.lt.u32.totalorder %s602_s3, %s650_s1 }
  0x60   : > { %p401_p2 = scmp.lt.u32.totalorder %s399_s22, %s395_s15  ;;  %p403_p8 = scmp.lt.u32.totalorder %s395_s15, %s602_s3 }
  0x61   : > { %p397_p10 = pnand %p396_p4, %p659_p9 }
  0x62   : > { %p402_p5 = por %p401_p2, %p400_p1 }
  0x63   : > { %p398_p12 = pneg %p397_p10 }
  0x64   : > { %p404_p11 = por %p403_p8, %p402_p5 }
  0x66   : > { %p405_p0 = pnand %p404_p11, %p398_p12 }
  0x68   : > { %408 = shalt.err (!%p405_p0)
}
  0x69   : > { %287 = dma.vmem_to_hbm [thread:$0]  (%p659_p9), %s597_s29, 128, %s602_s3, %s168_s4  }
  0x6a PF: > { %s196_s25 = sand.u32 1, %s443_s6   ;;  %p660_p7 = scmp.ne.s32.totalorder %s655_s21, 0 }
  0x6b   : > { %p661_p13 = scmp.ge.s32.totalorder %s463_s11, 2  ;;  %s197_s26 = scalar_lea.sflag [#allocation4], %s196_s25 }
  0x6d   : > { %p294_p3 = pnand %p661_p13, %p660_p7 }
  0x6f   : > { %438 = dma.done.wait (!%p294_p3), %s197_s26, 128  }
  0x70   : > { %440 = vsyncadd (!%p294_p3), %s197_s26, 4294967168  ;;  %s17_s11 = sadd.s32 1, %s463_s11   ;;  %s662_s6 = smov %s447_s7 }
  0x71   : > { %p14_p6 = scmp.ge.s32.totalorder %s17_s11, 4   ;;  %s663_s7 = smov %s451_s8 }
  0x72   : > { %s664_s8 = smov %s533_s20  ;;  %s665_s9 = smov %s459_s10 }
  0x73   : > { %s666_s10 = smov %s668_s14  ;;  %16 = sbr.rel (!%p14_p6) target bundleno = 6 (0x6), region = 69 }
  0x7a   :  { %202 = vsyncpa [#allocation3], 1 }
  0x7b   :  { %204 = vsyncpa [#allocation3 + $0x1], 1 }
  0x7c   :  { %205 = vsyncpa [#allocation4], 1 }
  0x7d   :  { %207 = vsyncpa [#allocation4 + $0x1], 1 }

</bundles_post_ra>
